<compile_context>
chip_gen: v5e
topology: v5e:2x2
jax: 0.10.0
libtpu: 0.0.40
codegen_flags: <defaults>
</compile_context>

<pallas_src>
import numpy as np

import jax
import jax.numpy as jnp
from jax.experimental import pallas as pl
from jax.experimental.pallas import tpu as pltpu


# --------------------------------------------------------------------------
# Kernel
# --------------------------------------------------------------------------
def _up_pad_concat_kernel(x1_ref, x2_ref, ah_ref, awt_ref, o_ref):
  """Fused bilinear-upsample(x1) + zero-pad + concat([x2, up(x1)], channel).

  x1_ref : (1, C1, H1, W1)  low-res feature map
  x2_ref : (1, C2, H2, W2)  skip connection (defines output spatial size)
  ah_ref : (H2, H1)         row-interp matrix (align_corners=True, pad folded)
  awt_ref: (W1, W2)         col-interp matrix (transposed, pad folded)
  o_ref  : (1, C2 + C1, H2, W2)
  """
  C1, H1, W1 = x1_ref.shape[1], x1_ref.shape[2], x1_ref.shape[3]
  C2 = x2_ref.shape[1]
  W2 = o_ref.shape[3]

  # ---- channel concat, part 1: copy the skip connection (one slab store) ----
  o_ref[0, 0:C2, :, :] = x2_ref[0]

  # ---- bilinear upsample of x1 (+ implicit zero padding) --------------------
  ah = ah_ref[...]                                   # (H2, H1)
  awt = awt_ref[...]                                 # (W1, W2)

  # W-direction interpolation for all channels in a single MXU matmul.
  x1_all = x1_ref[...].reshape(C1 * H1, W1).astype(jnp.float32)
  tw = jnp.dot(x1_all, awt, preferred_element_type=jnp.float32)  # (C1*H1, W2)
  tw = tw.reshape(C1, H1, W2)

  # H-direction interpolation per channel (C1 small -> static unroll); each
  # result is stored as one full (H2, W2) slab into the concat output.
  for c in range(C1):
    up = jnp.dot(ah, tw[c], preferred_element_type=jnp.float32)  # (H2, W2)
    o_ref[0, C2 + c, :, :] = up.astype(o_ref.dtype)


# --------------------------------------------------------------------------
# Interpolation-matrix construction (trace-time, static shapes)
# --------------------------------------------------------------------------
def _bilinear_matrix_align_corners(out_size, in_size, pad_before, target_size):
  """(target_size, in_size) matrix: bilinear upsample (align_corners=True)
  from `in_size` to `out_size`, placed at offset `pad_before` inside a
  zero-padded axis of `target_size` (negative offset == crop, like F.pad)."""
  A = np.zeros((target_size, in_size), np.float32)
  for r in range(target_size):
    i = r - pad_before
    if 0 <= i < out_size:
      src = 0.0 if out_size == 1 else i * (in_size - 1) / (out_size - 1)
      i0 = int(np.floor(src))
      i1 = min(i0 + 1, in_size - 1)
      w = src - i0
      A[r, i0] += 1.0 - w
      A[r, i1] += w
  return A


# --------------------------------------------------------------------------
# Wrapper
# --------------------------------------------------------------------------
def up_only_forward(x1, x2):
  """Pallas implementation of up_only.forward(x1, x2); NCHW like PyTorch."""
  N, C1, H1, W1 = x1.shape
  N2, C2, H2, W2 = x2.shape
  assert N == N2, "batch dims must match"
  H_up, W_up = 2 * H1, 2 * W1                  # nn.Upsample(scale_factor=2)

  # Replicate the PyTorch padding-split arithmetic (diffX -> H, diffY -> W).
  diffX = H2 - H_up
  diffY = W2 - W_up
  ch1 = int(diffX / 2)                         # top pad (rest goes to bottom)
  cw1 = int(diffY / 2)                         # left pad (rest goes to right)

  # Interpolation matrices with the zero padding folded in.
  ah = jnp.asarray(_bilinear_matrix_align_corners(H_up, H1, ch1, H2))  # (H2,H1)
  aw = _bilinear_matrix_align_corners(W_up, W1, cw1, W2)               # (W2,W1)
  awt = jnp.asarray(aw.T)                                              # (W1,W2)

  return pl.pallas_call(
      _up_pad_concat_kernel,
      out_shape=jax.ShapeDtypeStruct((N, C2 + C1, H2, W2), x2.dtype),
      grid=(N,),
      in_specs=[
          pl.BlockSpec((1, C1, H1, W1), lambda n: (n, 0, 0, 0)),
          pl.BlockSpec((1, C2, H2, W2), lambda n: (n, 0, 0, 0)),
          pl.BlockSpec((H2, H1), lambda n: (0, 0)),
          pl.BlockSpec((W1, W2), lambda n: (0, 0)),
      ],
      out_specs=pl.BlockSpec((1, C2 + C1, H2, W2), lambda n: (n, 0, 0, 0)),
      compiler_params=pltpu.CompilerParams(
          dimension_semantics=("parallel",)),
  )(x1, x2, ah, awt)


# --------------------------------------------------------------------------
# Demo / self-check
# --------------------------------------------------------------------------
if __name__ == "__main__":
  key = jax.random.PRNGKey(0)
  k1, k2 = jax.random.split(key)
  # Typical UNet up-step shapes (small): x1 low-res map, x2 skip connection.
  x1 = jax.random.normal(k1, (2, 4, 8, 8), jnp.float32)      # (N, C1, H1, W1)
  x2 = jax.random.normal(k2, (2, 4, 16, 16), jnp.float32)    # (N, C2, H2, W2)

  fwd = jax.jit(up_only_forward)
  out = jax.block_until_ready(fwd(x1, x2))

  assert out.shape == (2, 8, 16, 16), out.shape
  assert out.dtype == jnp.float32

  # Pure-JAX reference (same separable align_corners=True formulation).
  def reference(a1, a2):
    _, _, h1, w1 = a1.shape
    _, _, h2, w2 = a2.shape
    rah = jnp.asarray(
        _bilinear_matrix_align_corners(2 * h1, h1, int((h2 - 2 * h1) / 2), h2))
    raw = jnp.asarray(
        _bilinear_matrix_align_corners(2 * w1, w1, int((w2 - 2 * w1) / 2), w2))
    up = jnp.einsum("ih,nchw,jw->ncij", rah, a1, raw)
    return jnp.concatenate([a2, up], axis=1)

  ref = reference(x1, x2)
  assert bool(jnp.allclose(out, ref, atol=1e-2, rtol=1e-2)), (
      float(jnp.max(jnp.abs(out - ref))))

  print("KERNEL_OK")
</pallas_src>

<mosaic_0001>
module attributes {stable_mosaic.version = 11 : i64} {
  func.func @_up_pad_concat_kernel(%arg0: i32, %arg1: memref<1x4x8x8xf32, #tpu.memory_space<vmem>>, %arg2: memref<1x4x16x16xf32, #tpu.memory_space<vmem>>, %arg3: memref<16x8xf32, #tpu.memory_space<vmem>>, %arg4: memref<8x16xf32, #tpu.memory_space<vmem>>, %arg5: memref<1x8x16x16xf32, #tpu.memory_space<vmem>>) attributes {dimension_semantics = [#tpu.dimension_semantics<parallel>], iteration_bounds = array<i64: 2>, scalar_prefetch = 0 : i64, scratch_operands = 0 : i64, tpu.core_type = #tpu.core_type<tc>, window_params = [{transform_indices = @transform_0, window_bounds = array<i64: 1, 4, 8, 8>}, {transform_indices = @transform_1, window_bounds = array<i64: 1, 4, 16, 16>}, {pipeline_mode = #tpu.pipeline_mode<synchronous>, transform_indices = @transform_2, window_bounds = array<i64: 16, 8>}, {pipeline_mode = #tpu.pipeline_mode<synchronous>, transform_indices = @transform_3, window_bounds = array<i64: 8, 16>}, {transform_indices = @transform_4, window_bounds = array<i64: 1, 8, 16, 16>}]} {
    %c0 = arith.constant 0 : index
    %c0_0 = arith.constant 0 : index
    %c0_1 = arith.constant 0 : index
    %c0_2 = arith.constant 0 : index
    %0 = vector.load %arg2[%c0, %c0_0, %c0_1, %c0_2] : memref<1x4x16x16xf32, #tpu.memory_space<vmem>>, vector<1x4x16x16xf32>
    %1 = vector.shape_cast %0 : vector<1x4x16x16xf32> to vector<4x16x16xf32>
    %c0_3 = arith.constant 0 : index
    %c0_4 = arith.constant 0 : index
    %c0_5 = arith.constant 0 : index
    %c0_6 = arith.constant 0 : index
    %2 = vector.load %arg5[%c0_3, %c0_4, %c0_5, %c0_6] : memref<1x8x16x16xf32, #tpu.memory_space<vmem>>, vector<1x4x16x16xf32>
    %3 = vector.shape_cast %2 : vector<1x4x16x16xf32> to vector<4x16x16xf32>
    %4 = vector.shape_cast %1 : vector<4x16x16xf32> to vector<1x4x16x16xf32>
    tpu.vector_store %arg5[%c0_3, %c0_4, %c0_5, %c0_6], %4 {strides = array<i32>} : memref<1x8x16x16xf32, #tpu.memory_space<vmem>>, vector<1x4x16x16xf32>,
    %c0_7 = arith.constant 0 : index
    %c0_8 = arith.constant 0 : index
    %5 = vector.load %arg3[%c0_7, %c0_8] : memref<16x8xf32, #tpu.memory_space<vmem>>, vector<16x8xf32>
    %c0_9 = arith.constant 0 : index
    %c0_10 = arith.constant 0 : index
    %6 = vector.load %arg4[%c0_9, %c0_10] : memref<8x16xf32, #tpu.memory_space<vmem>>, vector<8x16xf32>
    %c0_11 = arith.constant 0 : index
    %c0_12 = arith.constant 0 : index
    %c0_13 = arith.constant 0 : index
    %c0_14 = arith.constant 0 : index
    %7 = vector.load %arg1[%c0_11, %c0_12, %c0_13, %c0_14] : memref<1x4x8x8xf32, #tpu.memory_space<vmem>>, vector<1x4x8x8xf32>
    %8 = vector.shape_cast %7 : vector<1x4x8x8xf32> to vector<32x8xf32>
    %cst = arith.constant dense<0.000000e+00> : vector<32x16xf32>
    %9 = tpu.matmul %8, %6, %cst {dimension_numbers = #tpu.dot_dimension_numbers<[1], [0], [0], [1], [0, 0, 1, 1], [], []>} : vector<32x8xf32>, vector<8x16xf32>, vector<32x16xf32> -> vector<32x16xf32>
    %10 = vector.shape_cast %9 : vector<32x16xf32> to vector<4x8x16xf32>
    %11 = vector.extract_strided_slice %10 {offsets = [0, 0, 0], sizes = [1, 8, 16], strides = [1, 1, 1]} : vector<4x8x16xf32> to vector<1x8x16xf32>
    %12 = vector.shape_cast %11 : vector<1x8x16xf32> to vector<8x16xf32>
    %cst_15 = arith.constant dense<0.000000e+00> : vector<16x16xf32>
    %13 = tpu.matmul %5, %12, %cst_15 {dimension_numbers = #tpu.dot_dimension_numbers<[1], [0], [0], [1], [0, 0, 1, 1], [], []>} : vector<16x8xf32>, vector<8x16xf32>, vector<16x16xf32> -> vector<16x16xf32>
    %c0_16 = arith.constant 0 : index
    %c4 = arith.constant 4 : index
    %c0_17 = arith.constant 0 : index
    %c0_18 = arith.constant 0 : index
    %14 = vector.load %arg5[%c0_16, %c4, %c0_17, %c0_18] : memref<1x8x16x16xf32, #tpu.memory_space<vmem>>, vector<1x1x16x16xf32>
    %15 = vector.shape_cast %14 : vector<1x1x16x16xf32> to vector<16x16xf32>
    %16 = vector.shape_cast %13 : vector<16x16xf32> to vector<1x1x16x16xf32>
    tpu.vector_store %arg5[%c0_16, %c4, %c0_17, %c0_18], %16 {strides = array<i32>} : memref<1x8x16x16xf32, #tpu.memory_space<vmem>>, vector<1x1x16x16xf32>,
    %17 = vector.extract_strided_slice %10 {offsets = [1, 0, 0], sizes = [1, 8, 16], strides = [1, 1, 1]} : vector<4x8x16xf32> to vector<1x8x16xf32>
    %18 = vector.shape_cast %17 : vector<1x8x16xf32> to vector<8x16xf32>
    %cst_19 = arith.constant dense<0.000000e+00> : vector<16x16xf32>
    %19 = tpu.matmul %5, %18, %cst_19 {dimension_numbers = #tpu.dot_dimension_numbers<[1], [0], [0], [1], [0, 0, 1, 1], [], []>} : vector<16x8xf32>, vector<8x16xf32>, vector<16x16xf32> -> vector<16x16xf32>
    %c0_20 = arith.constant 0 : index
    %c5 = arith.constant 5 : index
    %c0_21 = arith.constant 0 : index
    %c0_22 = arith.constant 0 : index
    %20 = vector.load %arg5[%c0_20, %c5, %c0_21, %c0_22] : memref<1x8x16x16xf32, #tpu.memory_space<vmem>>, vector<1x1x16x16xf32>
    %21 = vector.shape_cast %20 : vector<1x1x16x16xf32> to vector<16x16xf32>
    %22 = vector.shape_cast %19 : vector<16x16xf32> to vector<1x1x16x16xf32>
    tpu.vector_store %arg5[%c0_20, %c5, %c0_21, %c0_22], %22 {strides = array<i32>} : memref<1x8x16x16xf32, #tpu.memory_space<vmem>>, vector<1x1x16x16xf32>,
    %23 = vector.extract_strided_slice %10 {offsets = [2, 0, 0], sizes = [1, 8, 16], strides = [1, 1, 1]} : vector<4x8x16xf32> to vector<1x8x16xf32>
    %24 = vector.shape_cast %23 : vector<1x8x16xf32> to vector<8x16xf32>
    %cst_23 = arith.constant dense<0.000000e+00> : vector<16x16xf32>
    %25 = tpu.matmul %5, %24, %cst_23 {dimension_numbers = #tpu.dot_dimension_numbers<[1], [0], [0], [1], [0, 0, 1, 1], [], []>} : vector<16x8xf32>, vector<8x16xf32>, vector<16x16xf32> -> vector<16x16xf32>
    %c0_24 = arith.constant 0 : index
    %c6 = arith.constant 6 : index
    %c0_25 = arith.constant 0 : index
    %c0_26 = arith.constant 0 : index
    %26 = vector.load %arg5[%c0_24, %c6, %c0_25, %c0_26] : memref<1x8x16x16xf32, #tpu.memory_space<vmem>>, vector<1x1x16x16xf32>
    %27 = vector.shape_cast %26 : vector<1x1x16x16xf32> to vector<16x16xf32>
    %28 = vector.shape_cast %25 : vector<16x16xf32> to vector<1x1x16x16xf32>
    tpu.vector_store %arg5[%c0_24, %c6, %c0_25, %c0_26], %28 {strides = array<i32>} : memref<1x8x16x16xf32, #tpu.memory_space<vmem>>, vector<1x1x16x16xf32>,
    %29 = vector.extract_strided_slice %10 {offsets = [3, 0, 0], sizes = [1, 8, 16], strides = [1, 1, 1]} : vector<4x8x16xf32> to vector<1x8x16xf32>
    %30 = vector.shape_cast %29 : vector<1x8x16xf32> to vector<8x16xf32>
    %cst_27 = arith.constant dense<0.000000e+00> : vector<16x16xf32>
    %31 = tpu.matmul %5, %30, %cst_27 {dimension_numbers = #tpu.dot_dimension_numbers<[1], [0], [0], [1], [0, 0, 1, 1], [], []>} : vector<16x8xf32>, vector<8x16xf32>, vector<16x16xf32> -> vector<16x16xf32>
    %c0_28 = arith.constant 0 : index
    %c7 = arith.constant 7 : index
    %c0_29 = arith.constant 0 : index
    %c0_30 = arith.constant 0 : index
    %32 = vector.load %arg5[%c0_28, %c7, %c0_29, %c0_30] : memref<1x8x16x16xf32, #tpu.memory_space<vmem>>, vector<1x1x16x16xf32>
    %33 = vector.shape_cast %32 : vector<1x1x16x16xf32> to vector<16x16xf32>
    %34 = vector.shape_cast %31 : vector<16x16xf32> to vector<1x1x16x16xf32>
    tpu.vector_store %arg5[%c0_28, %c7, %c0_29, %c0_30], %34 {strides = array<i32>} : memref<1x8x16x16xf32, #tpu.memory_space<vmem>>, vector<1x1x16x16xf32>,
    return
  }
  func.func @transform_0(%arg0: i32) -> (i32, i32, i32, i32) {
    %c0_i32 = arith.constant 0 : i32
    %c0_i32_0 = arith.constant 0 : i32
    %c0_i32_1 = arith.constant 0 : i32
    %c0_i32_2 = arith.constant 0 : i32
    return %arg0, %c0_i32, %c0_i32_0, %c0_i32_1 : i32, i32, i32, i32
  }
  func.func @transform_1(%arg0: i32) -> (i32, i32, i32, i32) {
    %c0_i32 = arith.constant 0 : i32
    %c0_i32_0 = arith.constant 0 : i32
    %c0_i32_1 = arith.constant 0 : i32
    %c0_i32_2 = arith.constant 0 : i32
    return %arg0, %c0_i32, %c0_i32_0, %c0_i32_1 : i32, i32, i32, i32
  }
  func.func @transform_2(%arg0: i32) -> (i32, i32) {
    %c0_i32 = arith.constant 0 : i32
    %c0_i32_0 = arith.constant 0 : i32
    %c0_i32_1 = arith.constant 0 : i32
    return %c0_i32, %c0_i32_0 : i32, i32
  }
  func.func @transform_3(%arg0: i32) -> (i32, i32) {
    %c0_i32 = arith.constant 0 : i32
    %c0_i32_0 = arith.constant 0 : i32
    %c0_i32_1 = arith.constant 0 : i32
    return %c0_i32, %c0_i32_0 : i32, i32
  }
  func.func @transform_4(%arg0: i32) -> (i32, i32, i32, i32) {
    %c0_i32 = arith.constant 0 : i32
    %c0_i32_0 = arith.constant 0 : i32
    %c0_i32_1 = arith.constant 0 : i32
    %c0_i32_2 = arith.constant 0 : i32
    return %arg0, %c0_i32, %c0_i32_0, %c0_i32_1 : i32, i32, i32, i32
  }
}

</mosaic_0001>

<bundles_post_ra>
// kernel: up_only_forward.1
= control target key start
LH: loop header
LB: loop body
LE: loop exit
PB: predicated region body
PF: predicated region fallthrough
CT: control target
= control target key end

     0   :  { %s1194_s0 = inlined_call_operand.hbm [shape: f32[2,4,8,8], index: 0, kind: input, shape index: {}]   ;;  %s1195_s1 = inlined_call_operand.hbm [shape: f32[2,4,16,16], index: 1, kind: input, shape index: {}]   ;;  %s1196_s2 = inlined_call_operand.hbm [shape: f32[16,8], index: 2, kind: input, shape index: {}]   ;;  %s1197_s3 = inlined_call_operand.hbm [shape: f32[8,16], index: 3, kind: input, shape index: {}]   ;;  %s1198_s4 = inlined_call_operand.hbm [shape: f32[2,8,16,16], index: 4, kind: output, shape index: {}]  }
   0x1   :  { %1203 = sst [smem:[#allocation17_spill]] %s1196_s2 }
   0x2   :  { %1204 = sst [smem:[#allocation18_spill]] %s1197_s3 }
   0x3   :  { %9 = vsyncpa [#allocation3], 0 }
   0x4   :  { %11 = vsyncpa [#allocation3 + $0x1], 0 }
   0x5   :  { %12 = vsyncpa [#allocation6], 0 }
   0x6   :  { %14 = vsyncpa [#allocation6 + $0x1], 0 }
   0x7   :  { %15 = vsyncpa [#allocation9], 0 }
   0x8   :  { %16 = vsyncpa [#allocation4], 0 }
   0x9   :  { %18 = vsyncpa [#allocation4 + $0x1], 0  ;;  %s952_s15 = smov 0   ;;  %s954_s16 = smov 0  }
   0xa   :  { %s956_s17 = smov 0   ;;  %s958_s18 = smov 0  }
   0xb LB: > { %s973_s19 = sadd.s32 4294967295, %s919_s18   ;;  %s598_s20 = sadd.s32 4294967294, %s919_s18   ;;  %s919_s18 = sphi %s958_s18, %s1220_s18   ;;  %s915_s17 = sphi %s956_s17, %s1219_s17   ;;  %s911_s16 = sphi %s954_s16, %s1218_s16   ;;  %s907_s15 = sphi %s952_s15, %s1217_s15  }
   0xc   : > { %p44_p0 = scmp.ne.s32.totalorder %s911_s16, %s907_s15  ;;  %p45_p1 = scmp.eq.s32.totalorder %s973_s19, 0 }
   0xd   : > { %p136_p2 = scmp.eq.s32.totalorder %s973_s19, 1  ;;  %p142_p3 = scmp.eq.s32.totalorder %s598_s20, 1 }
   0xe   : > { %p982_p4 = por %p45_p1, %p44_p0  ;;  %p599_p5 = scmp.ge.s32.totalorder %s919_s18, 1 }
   0xf   : > { %p987_p6 = por %p142_p3, %p44_p0  ;;  %p149_p7 = scmp.lt.s32.totalorder %s919_s18, 3 }
  0x10   : > { %s1207_s2 = sld [smem:[#allocation17_spill]]  ;;  %s921_s27 = smov [#allocation7]  }
  0x11   : > { %p995_p8 = pnand %p599_p5, %p149_p7  ;;  %s162_s28 = sshll.u32 %s921_s27, 4  ;;  %s163_s28 = int_to_ptr.vmem [resolvable:$true] %s162_s28 }
  0x12   : > { %s1209_s3 = sld [smem:[#allocation18_spill]]  ;;  %s1199_s6 = smov 128  }
  0x13   : > { %p659_p9 = pneg %p995_p8  ;;  %s1201_s7 = smov 8  }
  0x14   : > { %s924_s8 = smov [#allocation8]   ;;  %s1011_s10 = sadd.s32 1, %s919_s18  }
  0x15   : > { %p660_p10 = pnand %p659_p9, %p45_p1  ;;  %s177_s9 = sshll.u32 %s924_s8, 4  ;;  %s178_s9 = int_to_ptr.vmem [resolvable:$true] %s177_s9 }
  0x16   : > { %s160_s25 = sshll.u32 %s1207_s2, 4  ;;  %s31_s11 = sadd.s32 1, %s915_s17  ;;  %s161_s25 = int_to_ptr.hbm [resolvable:$true] %s160_s25 }
  0x17   : > { %662 = dma.hbm_to_vmem [thread:$0]  (!%p660_p10), %s161_s25, 256, %s163_s28, [#allocation6], %s1199_s6, %s1199_s6, %s1201_s7  }
  0x18   : > { %s175_s5 = sshll.u32 %s1209_s3, 4  ;;  %s28_s12 = ssub.s32 %s919_s18, %s1011_s10  ;;  %s176_s5 = int_to_ptr.hbm [resolvable:$true] %s175_s5 }
  0x19   : > { %665 = dma.hbm_to_vmem [thread:$0]  (!%p660_p10), %s176_s5, 128, %s178_s9, [#allocation9]  }
  0x1a   : > { %p38_p12 = scmp.ne.s32.totalorder %s915_s17, %s911_s16  ;;  %p29_p13 = scmp.eq.s32.totalorder %s28_s12, 0 }
  0x1b   : > { %p39_p0 = scmp.eq.s32.totalorder %s919_s18, 0  ;;  %p679_p5 = scmp.lt.s32.totalorder %s919_s18, 2 }
  0x1c   : > { %p1021_p3 = por %p136_p2, %p38_p12  ;;  %s1030_s20 = sand.u32 1, %s915_s17  }
  0x1d   : > { %s1027_s14 = scalar_select %p29_p13, %s915_s17, %s31_s11  }
  0x1e   : > { %p40_p7 = por %p39_p0, %p38_p12  ;;  %s603_s23 = sshll.u32 %s1030_s20, 5 }
  0x1f   : > { %1211 = sst [smem:[#allocation16_spill]] %s1027_s14  ;;  %s640_s24 = sshll.u32 %s919_s18, 5 }
  0x20   : > { %s197_s28 = scalar_lea.hbm %s1194_s0, %s640_s24  ;;  %s192_s29 = scalar_lea.vmem [#allocation2], %s603_s23 }
  0x21   : > { %s200_s30 = sshll.u32 %s192_s29, 4  ;;  %s198_s5 = sshll.u32 %s197_s28, 4  ;;  %s201_s30 = int_to_ptr.vmem [resolvable:$true] %s200_s30  ;;  %s199_s5 = int_to_ptr.hbm [resolvable:$true] %s198_s5 }
  0x22   : > { %p1037_p2 = pnand %p679_p5, %p40_p7  ;;  %s210_s9 = sand.u32 1, %s919_s18  }
  0x23   : > { %s606_s11 = sshll.u32 %s1030_s20, 6  ;;  %s189_s12 = scalar_lea.sflag [#allocation3], %s1030_s20 }
  0x24   : > { %s781_s6 = sshra.s32 %s199_s5, 4  ;;  %p785_p10 = pneg %p1037_p2  ;;  %s782_s6 = int_to_ptr.hbm [resolvable:$true] %s781_s6 }
  0x25   : > { %s783_s7 = scalar_lea.hbm %s782_s6, 32  ;;  %s788_s25 = scalar_lea.hbm %s1194_s0, 64 }
  0x26   : > { %p784_p9 = scmp.ne.s32.totalorder %s782_s6, %s783_s7  ;;  %p789_p0 = scmp.lt.s32.totalorder %s782_s6, %s1194_s0 }
  0x27   : > { %p790_p5 = scmp.lt.s32.totalorder %s788_s25, %s783_s7 }
  0x28   : > { %p786_p12 = pnand %p785_p10, %p784_p9 }
  0x29   : > { %p791_p7 = por %p790_p5, %p789_p0 }
  0x2a   : > { %p787_p13 = pneg %p786_p12 }
  0x2c   : > { %p792_p11 = pnand %p791_p7, %p787_p13 }
  0x2e   : > { %795 = shalt.err (!%p792_p11)
}
  0x2f   : > { %s1213_s20 = smov 8   ;;  %s1214_s29 = smov 128  }
  0x30   : > { %669 = dma.hbm_to_vmem [thread:$0]  (!%p1037_p2), %s199_s5, 512, %s201_s30, %s189_s12, %s1214_s29, %s1214_s29, %s1213_s20  }
  0x31   : > { %s641_s2 = sshll.u32 %s919_s18, 6  ;;  %s214_s14 = scalar_lea.vmem [#allocation5], %s606_s11 }
  0x32   : > { %s219_s24 = scalar_lea.hbm %s1195_s1, %s641_s2  ;;  %s222_s27 = sshll.u32 %s214_s14, 4  ;;  %s223_s27 = int_to_ptr.vmem [resolvable:$true] %s222_s27 }
  0x33   : > { %s220_s6 = sshll.u32 %s219_s24, 4  ;;  %s211_s7 = scalar_lea.sflag [#allocation6], %s210_s9  ;;  %s221_s6 = int_to_ptr.hbm [resolvable:$true] %s220_s6 }
  0x34   : > { %s811_s25 = sshra.s32 %s221_s6, 4  ;;  %s818_s12 = scalar_lea.hbm %s1195_s1, 128  ;;  %s812_s25 = int_to_ptr.hbm [resolvable:$true] %s811_s25 }
  0x35   : > { %s813_s28 = scalar_lea.hbm %s812_s25, 64  ;;  %p819_p13 = scmp.lt.s32.totalorder %s812_s25, %s1195_s1 }
  0x36   : > { %p814_p11 = scmp.ne.s32.totalorder %s812_s25, %s813_s28  ;;  %p820_p0 = scmp.lt.s32.totalorder %s818_s12, %s813_s28 }
  0x38   : > { %p816_p9 = pnand %p814_p11, %p785_p10  ;;  %p821_p5 = por %p820_p0, %p819_p13 }
  0x3a   : > { %p817_p12 = pneg %p816_p9 }
  0x3c   : > { %p822_p7 = pnand %p821_p5, %p817_p12 }
  0x3e   : > { %825 = shalt.err (!%p822_p7)
}
  0x3f   : > { %672 = dma.hbm_to_vmem [thread:$0]  (!%p1037_p2), %s221_s6, 1024, %s223_s27, %s211_s7, %s1214_s29, %s1214_s29, %s1213_s20  }
  0x40   : > { %234 = sbr.rel (%p995_p8) target bundleno = 366 (0x16e), region = 36  ;;  %s1081_s14 = sand.u32 (!%p995_p8), 1, %s911_s16  }
  0x41   : > { %s610_s9 = sshll.u32 (!%p995_p8), %s1081_s14, 5  ;;  %s237_s11 = scalar_lea.sflag (!%p995_p8), [#allocation3], %s1081_s14 }
  0x42   : > { %s240_s23 = scalar_lea.vmem (!%p995_p8), [#allocation2], %s610_s9 }
  0x45   : > { %886 = dma.done.wait (%p982_p4), %s237_s11, 512  }
  0x46   : > { %888 = vsyncadd (%p982_p4), %s237_s11, 4294966784  ;;  %s246_s8 = sand.u32 1, %s973_s19   ;;  %s611_s26 = sshll.u32 %s1081_s14, 6 }
  0x47   : > { %s247_s20 = scalar_lea.sflag [#allocation6], %s246_s8  ;;  %s1091_s29 = scalar_lea.vmem [#allocation5], %s611_s26 }
  0x48   : > { %890 = dma.done.wait (%p982_p4), %s247_s20, 1024  }
  0x49   : > { %892 = vsyncadd (%p982_p4), %s247_s20, 4294966272 }
  0x4a   : > { %894 = dma.done.wait (%p45_p1), [#allocation6], 256  }
  0x4b   : > { %896 = vsyncadd (%p45_p1), [#allocation6], 4294967040 }
  0x4c   : > { %898 = dma.done.wait (%p45_p1), [#allocation9], 128  }
  0x4d   : > { %900 = vsyncadd (%p45_p1), [#allocation9], 4294967168  ;;  %vm315_vm0 = vcmask 64512   ;;  %v310_v0 = vld [vmem:[#allocation8] sm:$0xff]  ;;  %v311_v1 = vld [vmem:[%s240_s23] sm:$0xff]  ;;  %s614_s21 = sshll.u32 %s1081_s14, 7 }
  0x4e   : > { %343 = vmatpush.msra.mxu0 %v310_v0  ;;  %643 = vmatpush.msra.mxu2 %v310_v0  ;;  %v314_v2 = vld [vmem:[%s240_s23 + $0x18] sm:$0xff]  ;;  %v312_v3 = vld [vmem:[%s240_s23 + $0x8] sm:$0xff]  ;;  %v313_v4 = vld [vmem:[%s240_s23 + $0x10] sm:$0xff]  ;;  %vm299_vm1 = vcmask 130048   ;;  %s1121_s24 = scalar_lea.vmem [#allocation10], %s614_s21  ;;  %s642_s27 = sshll.u32 %s973_s19, 7 }
  0x4f   : > { %615 = vmatmul.msk.f32.vlgmr.msra.gmra.mxu0 %vm315_vm0, %v311_v1  ;;  %618 = vmatmul.msk.f32.vlgmr.msra.gmra.mxu2 %vm315_vm0, %v314_v2  ;;  %v309_v5 = vld [vmem:[#allocation7 + $0x8] sm:$0xff]  ;;  %v308_v6 = vld [vmem:[#allocation7] sm:$0xff]  ;;  %v293_v13 = vld [vmem:[%s1091_s29 + $0x10] sm:$0xff]  ;;  %s479_s25 = scalar_lea.hbm %s1198_s4, %s642_s27  ;;  %s480_s28 = sshll.u32 %s1121_s24, 4  ;;  %s481_s28 = int_to_ptr.vmem [resolvable:$true] %s480_s28 }
  0x50   : > { %v291_v11 = vld [vmem:[%s1091_s29] sm:$0xff]  ;;  %v292_v12 = vld [vmem:[%s1091_s29 + $0x8] sm:$0xff]  ;;  %v294_v15 = vld [vmem:[%s1091_s29 + $0x18] sm:$0xff]  ;;  %302 = vst.msk [vmem:[%s1121_s24 + $0x10] sm:$0xff] %vm299_vm1, %v293_v13  ;;  %s482_s30 = sshll.u32 %s479_s25, 4  ;;  %s468_s5 = scalar_lea.sflag [#allocation4], %s1081_s14  ;;  %s483_s30 = int_to_ptr.hbm [resolvable:$true] %s482_s30 }
  0x51   : > { %300 = vst.msk [vmem:[%s1121_s24] sm:$0xff] %vm299_vm1, %v291_v11  ;;  %v295_v16 = vld [vmem:[%s1091_s29 + $0x20] sm:$0xff]  ;;  %v296_v17 = vld [vmem:[%s1091_s29 + $0x28] sm:$0xff]  ;;  %v297_v18 = vld [vmem:[%s1091_s29 + $0x30] sm:$0xff]  ;;  %s855_s19 = sshra.s32 %s483_s30, 4  ;;  %s861_s9 = scalar_lea.hbm %s1198_s4, 256  ;;  %s856_s19 = int_to_ptr.hbm [resolvable:$true] %s855_s19 }
  0x52   : > { %301 = vst.msk [vmem:[%s1121_s24 + $0x8] sm:$0xff] %vm299_vm1, %v292_v12  ;;  %v298_v19 = vld [vmem:[%s1091_s29 + $0x38] sm:$0xff]  ;;  %s857_s12 = scalar_lea.hbm %s856_s19, 128  ;;  %p862_p2 = scmp.lt.s32.totalorder %s856_s19, %s1198_s4 }
  0x53   : > { %303 = vst.msk [vmem:[%s1121_s24 + $0x18] sm:$0xff] %vm299_vm1, %v294_v15  ;;  %p858_p1 = scmp.ne.s32.totalorder %s856_s19, %s857_s12  ;;  %p863_p10 = scmp.lt.s32.totalorder %s861_s9, %s857_s12 }
  0x54   : > { %304 = vst.msk [vmem:[%s1121_s24 + $0x20] sm:$0xff] %vm299_vm1, %v295_v16 }
  0x55   : > { %305 = vst.msk [vmem:[%s1121_s24 + $0x28] sm:$0xff] %vm299_vm1, %v296_v17  ;;  %p859_p4 = pnand %p858_p1, %p1021_p3  ;;  %p864_p11 = por %p863_p10, %p862_p2 }
  0x56   : > { %306 = vst.msk [vmem:[%s1121_s24 + $0x30] sm:$0xff] %vm299_vm1, %v297_v18 }
  0x57   : > { %616 = vmatmul.msk.f32.gmra.mxu0 %vm315_vm0, %v312_v3  ;;  %307 = vst.msk [vmem:[%s1121_s24 + $0x38] sm:$0xff] %vm299_vm1, %v298_v19  ;;  %p860_p8 = pneg %p859_p4 }
  0x59   : > { %p865_p9 = pnand %p864_p11, %p860_p8 }
  0x5f   : > { %617 = vmatmul.msk.f32.gmra.mxu0 %vm315_vm0, %v313_v4 }
  0xcc   : > { %v345_v7 = vpop.f32.mrf.mxu0 }
  0xcd   : > { %378 = vmatpush.msra.mxu1 %v345_v7  ;;  %644 = vmatpush.msra.mxu3 %v345_v7 }
  0xce   : > { %620 = vmatmul.msk.f32.vlgmr.msra.gmra.mxu3 %vm315_vm0, %v309_v5  ;;  %619 = vmatmul.msk.f32.vlgmr.msra.gmra.mxu1 %vm315_vm0, %v308_v6 }
  0xd2   : > { %v354_v8 = vpop.f32.mrf.mxu2 }
  0xd3   : > { %456 = vmatpush.msrb.mxu1 %v354_v8 }
  0xd4   : > { %v348_v9 = vpop.f32.mrf.mxu0 }
  0xd5   : > { %404 = vmatpush.msrb.mxu2 %v348_v9 }
  0xd6   : > { %623 = vmatmul.msk.f32.vlgmr.msrb.gmra.mxu2 %vm315_vm0, %v308_v6  ;;  %631 = vmatmul.msk.f32.vlgmr.msrb.gmra.mxu1 %vm315_vm0, %v308_v6 }
  0xdc   : > { %v351_v10 = vpop.f32.mrf.mxu0 }
  0xdd   : > { %430 = vmatpush.msrb.mxu3 %v351_v10 }
  0xde   : > { %627 = vmatmul.msk.f32.vlgmr.msrb.gmra.mxu3 %vm315_vm0, %v308_v6  ;;  %624 = vmatmul.msk.f32.gmra.mxu2 %vm315_vm0, %v309_v5 }
  0xdf   : > { %632 = vmatmul.msk.f32.gmra.mxu1 %vm315_vm0, %v309_v5 }
  0xe6   : > { %628 = vmatmul.msk.f32.gmra.mxu3 %vm315_vm0, %v309_v5 }
 0x14b   : > { %v380_v14 = vpop.f32.mrf.mxu1 }
 0x14c   : > { %621 = vst.msk [vmem:[%s1121_s24 + $0x40] sm:$0xff] %vm299_vm1, %v380_v14 }
 0x151   : > { %v383_v20 = vpop.f32.mrf.mxu3 }
 0x152   : > { %622 = vst.msk [vmem:[%s1121_s24 + $0x48] sm:$0xff] %vm299_vm1, %v383_v20 }
 0x153   : > { %v458_v21 = vpop.f32.mrf.mxu1 }
 0x154   : > { %633 = vst.msk [vmem:[%s1121_s24 + $0x70] sm:$0xff] %vm299_vm1, %v458_v21 }
 0x159   : > { %v406_v22 = vpop.f32.mrf.mxu2 }
 0x15a   : > { %625 = vst.msk [vmem:[%s1121_s24 + $0x50] sm:$0xff] %vm299_vm1, %v406_v22 }
 0x15c   : > { %v461_v23 = vpop.f32.mrf.mxu1 }
 0x15d   : > { %634 = vst.msk [vmem:[%s1121_s24 + $0x78] sm:$0xff] %vm299_vm1, %v461_v23 }
 0x161   : > { %v432_v24 = vpop.f32.mrf.mxu3  ;;  %v409_v25 = vpop.f32.mrf.mxu2 }
 0x162   : > { %629 = vst.msk [vmem:[%s1121_s24 + $0x60] sm:$0xff] %vm299_vm1, %v432_v24 }
 0x163   : > { %626 = vst.msk [vmem:[%s1121_s24 + $0x58] sm:$0xff] %vm299_vm1, %v409_v25 }
 0x169   : > { %v435_v26 = vpop.f32.mrf.mxu3 }
 0x16a   : > { %630 = vst.msk [vmem:[%s1121_s24 + $0x68] sm:$0xff] %vm299_vm1, %v435_v26 }
 0x16b   : > { %868 = shalt.err (!%p865_p9)
}
 0x16c   : > { %s925_s14 = smov 128   ;;  %s926_s8 = smov 8  }
 0x16d   : > { %657 = dma.vmem_to_hbm [thread:$0]  (%p1021_p3), %s481_s28, 2048, %s483_s30, %s468_s5, %s925_s14, %s925_s14, %s926_s8  }
 0x16e PF: > { %s497_s26 = sand.u32 1, %s907_s15   ;;  %p1215_p12 = scmp.ge.s32.totalorder %s919_s18, 2 }
 0x16f   : > { %s498_s20 = scalar_lea.sflag [#allocation4], %s497_s26 }
 0x170   : > { %p674_p13 = pnand %p1215_p12, %p987_p6 }
 0x172   : > { %p675_p0 = pneg %p674_p13 }
 0x174   : > { %902 = dma.done.wait (%p675_p0), %s498_s20, 2048  }
 0x175   : > { %904 = vsyncadd (%p675_p0), %s498_s20, 4294965248  ;;  %s1216_s29 = sld [smem:[#allocation16_spill]]  ;;  %p21_p5 = scmp.ge.s32.totalorder %s1011_s10, 4  }
 0x176   : > { %s1217_s15 = smov %s911_s16  ;;  %s1218_s16 = smov %s915_s17 }
 0x177   : > { %s1220_s18 = smov %s1011_s10  ;;  %23 = sbr.rel (!%p21_p5) target bundleno = 11 (0xb), region = 106 }
 0x17b   : > { %s1219_s17 = smov %s1216_s29 }
 0x17c   :  { %504 = vsyncpa [#allocation3], 1 }
 0x17d   :  { %506 = vsyncpa [#allocation3 + $0x1], 1 }
 0x17e   :  { %507 = vsyncpa [#allocation6], 1 }
 0x17f   :  { %509 = vsyncpa [#allocation6 + $0x1], 1 }
 0x180   :  { %510 = vsyncpa [#allocation9], 1 }
 0x181   :  { %511 = vsyncpa [#allocation4], 1 }
 0x182   :  { %513 = vsyncpa [#allocation4 + $0x1], 1 }

</bundles_post_ra>
